<compile_context>
chip_gen: v7x
topology: tpu7x:2x2x1
jax: 0.10.0
libtpu: 0.0.40
codegen_flags: <defaults>
</compile_context>

<pallas_src>
import math

import jax
import jax.numpy as jnp
from jax.experimental import pallas as pl
from jax.experimental.pallas import tpu as pltpu


def _attn_kernel(x_ref, wq_ref, wk_ref, wv_ref, wo_ref, b_ref, o_ref):
    """Causal multi-head self-attention for one batch block.

    x_ref  : (BB, T, D)     activations
    wq/wk/wv_ref : (NH, D, DH)   per-head projection weights
    wo_ref : (NH, DH, DP)   per-head output-projection weights (DP = D padded to 128)
    b_ref  : (1, DP)        output bias (zero-padded)
    o_ref  : (BB, T, DP)    output (lane-dense last dim)
    """
    BB, T, D = x_ref.shape
    NH, _, DH = wq_ref.shape
    DP = wo_ref.shape[2]
    G = BB * NH
    scale = 1.0 / math.sqrt(DH)

    x = x_ref[...]                                        # native dtype, no upcast

    # Fuse (batch, head) into one dot_general batch axis G.  Broadcasts only touch
    # leading (non-minor) axes, so there is no lane/sublane relayout.
    x_g = jnp.broadcast_to(x[:, None], (BB, NH, T, D)).reshape(G, T, D)
    wq_g = jnp.broadcast_to(wq_ref[...][None], (BB, NH, D, DH)).reshape(G, D, DH)
    wk_g = jnp.broadcast_to(wk_ref[...][None], (BB, NH, D, DH)).reshape(G, D, DH)
    wv_g = jnp.broadcast_to(wv_ref[...][None], (BB, NH, D, DH)).reshape(G, D, DH)
    wo_g = jnp.broadcast_to(wo_ref[...][None], (BB, NH, DH, DP)).reshape(G, DH, DP)

    # Batched Q/K/V projections (MXU, f32 accumulate).
    q = jnp.einsum('gtd,gdf->gtf', x_g, wq_g, preferred_element_type=jnp.float32)
    k = jnp.einsum('gtd,gdf->gtf', x_g, wk_g, preferred_element_type=jnp.float32)
    v = jnp.einsum('gtd,gdf->gtf', x_g, wv_g, preferred_element_type=jnp.float32)

    # Attention scores + causal mask.
    s = jnp.einsum('gtf,gsf->gts', q, k, preferred_element_type=jnp.float32) * scale
    row = jax.lax.broadcasted_iota(jnp.int32, (T, T), 0)
    col = jax.lax.broadcasted_iota(jnp.int32, (T, T), 1)
    causal = row >= col
    s = jnp.where(causal[None], s, jnp.float32(-1e30))    # finite fill, NaN-safe

    # Softmax (f32); reciprocal on the otherwise-idle EUP slot.
    m = jnp.max(s, axis=-1, keepdims=True)
    p = jnp.exp(s - m)
    l = jnp.sum(p, axis=-1, keepdims=True)
    p = p * pl.reciprocal(l, approx=True)
    # TODO(synk): attn_dropout is identity here (inference mode).

    y = jnp.einsum('gts,gsf->gtf', p, v, preferred_element_type=jnp.float32)   # (G, T, DH)

    # Per-head output projection, then sum over heads (== concat + (D, D) matmul).
    out_g = jnp.einsum('gtf,gfd->gtd', y, wo_g, preferred_element_type=jnp.float32)  # (G, T, DP)
    out = out_g.reshape(BB, NH, T, DP).sum(axis=1) + b_ref[...][None]                # (BB, T, DP)
    # TODO(synk): output_dropout is identity here (inference mode).
    o_ref[...] = out.astype(o_ref.dtype)


def causal_self_attention(x, w_qkv, w_out, b_out, *, num_heads, batch_block=None):
    """x: (B, T, D); w_qkv: (D, 3D); w_out: (D, D); b_out: (D,).

    Weights are stored transposed relative to PyTorch (y = x @ W), matching the
    previous version of this kernel.
    """
    B, T, D = x.shape
    NH = num_heads
    assert D % NH == 0
    DH = D // NH
    DP = ((D + 127) // 128) * 128                    # lane-dense output width
    BB = B if batch_block is None else min(batch_block, B)
    assert B % BB == 0

    # Trace-time parameter rearrangement (tiny; no per-element compute on x).
    wq, wk, wv = jnp.split(w_qkv, 3, axis=1)                   # each (D, D)
    wq_h = wq.reshape(D, NH, DH).transpose(1, 0, 2)            # (NH, D, DH)
    wk_h = wk.reshape(D, NH, DH).transpose(1, 0, 2)
    wv_h = wv.reshape(D, NH, DH).transpose(1, 0, 2)
    wo_h = jnp.pad(w_out.reshape(NH, DH, D), ((0, 0), (0, 0), (0, DP - D)))  # (NH, DH, DP)
    b_p = jnp.pad(b_out, (0, DP - D)).reshape(1, DP)

    out_p = pl.pallas_call(
        _attn_kernel,
        out_shape=jax.ShapeDtypeStruct((B, T, DP), x.dtype),
        grid_spec=pltpu.PrefetchScalarGridSpec(
            num_scalar_prefetch=0,
            grid=(B // BB,),
            in_specs=[
                pl.BlockSpec((BB, T, D), lambda i: (i, 0, 0)),      # x
                pl.BlockSpec((NH, D, DH), lambda i: (0, 0, 0)),     # wq (resident)
                pl.BlockSpec((NH, D, DH), lambda i: (0, 0, 0)),     # wk (resident)
                pl.BlockSpec((NH, D, DH), lambda i: (0, 0, 0)),     # wv (resident)
                pl.BlockSpec((NH, DH, DP), lambda i: (0, 0, 0)),    # w_out (resident)
                pl.BlockSpec((1, DP), lambda i: (0, 0)),            # bias
            ],
            out_specs=pl.BlockSpec((BB, T, DP), lambda i: (i, 0, 0)),
        ),
        compiler_params=pltpu.CompilerParams(
            dimension_semantics=("parallel",)),
    )(x, wq_h, wk_h, wv_h, wo_h, b_p)

    return out_p[..., :D] if DP != D else out_p


def _reference(x, w_qkv, w_out, b_out, num_heads):
    """Pure-JAX reference mirroring the PyTorch forward (dropout = identity)."""
    B, T, D = x.shape
    NH, DH = num_heads, D // num_heads
    qkv = x @ w_qkv                                    # (B, T, 3D)
    q, k, v = jnp.split(qkv, 3, axis=-1)
    q = q.reshape(B, T, NH, DH).transpose(0, 2, 1, 3)
    k = k.reshape(B, T, NH, DH).transpose(0, 2, 1, 3)
    v = v.reshape(B, T, NH, DH).transpose(0, 2, 1, 3)
    att = (q @ jnp.swapaxes(k, -2, -1)) / math.sqrt(DH)
    mask = jnp.tril(jnp.ones((T, T)))[None, None]
    att = jnp.where(mask == 0, -jnp.inf, att)
    att = jax.nn.softmax(att, axis=-1)
    y = att @ v
    y = y.transpose(0, 2, 1, 3).reshape(B, T, D)
    return y @ w_out + b_out


if __name__ == "__main__":
    # Small shapes consistent with the module: B=2, T=context_length=8, D=32, heads=4.
    B, T, D, NH = 2, 8, 32, 4
    key = jax.random.PRNGKey(0)
    kx, kq, kw, kb = jax.random.split(key, 4)

    x = jax.random.normal(kx, (B, T, D), dtype=jnp.float32)

    bound = 1.0 / math.sqrt(D)
    w_qkv = jax.random.uniform(kq, (D, 3 * D), minval=-bound, maxval=bound,
                               dtype=jnp.float32)
    w_out = jax.random.uniform(kw, (D, D), minval=-bound, maxval=bound,
                               dtype=jnp.float32)
    b_out = jax.random.uniform(kb, (D,), minval=-bound, maxval=bound,
                               dtype=jnp.float32)

    out = causal_self_attention(x, w_qkv, w_out, b_out, num_heads=NH)
    out = jax.block_until_ready(out)

    ref = _reference(x, w_qkv, w_out, b_out, NH)
    assert out.shape == (B, T, D)
    # Tolerance accounts for the approximate (EUP) reciprocal in the softmax.
    assert jnp.allclose(out, ref, atol=2e-3, rtol=2e-3), "mismatch vs reference"

    print("KERNEL_OK")
</pallas_src>

<mosaic_0001>
module attributes {stable_mosaic.version = 11 : i64} {
  func.func @_attn_kernel(%arg0: i32, %arg1: memref<2x8x32xf32, #tpu.memory_space<vmem>>, %arg2: memref<4x32x8xf32, #tpu.memory_space<vmem>>, %arg3: memref<4x32x8xf32, #tpu.memory_space<vmem>>, %arg4: memref<4x32x8xf32, #tpu.memory_space<vmem>>, %arg5: memref<4x8x128xf32, #tpu.memory_space<vmem>>, %arg6: memref<1x128xf32, #tpu.memory_space<vmem>>, %arg7: memref<2x8x128xf32, #tpu.memory_space<vmem>>) attributes {dimension_semantics = [#tpu.dimension_semantics<parallel>], iteration_bounds = array<i64: 1>, scalar_prefetch = 0 : i64, scratch_operands = 0 : i64, tpu.core_type = #tpu.core_type<tc>, window_params = [{transform_indices = @transform_0, window_bounds = array<i64: 2, 8, 32>}, {pipeline_mode = #tpu.pipeline_mode<synchronous>, transform_indices = @transform_1, window_bounds = array<i64: 4, 32, 8>}, {pipeline_mode = #tpu.pipeline_mode<synchronous>, transform_indices = @transform_2, window_bounds = array<i64: 4, 32, 8>}, {pipeline_mode = #tpu.pipeline_mode<synchronous>, transform_indices = @transform_3, window_bounds = array<i64: 4, 32, 8>}, {pipeline_mode = #tpu.pipeline_mode<synchronous>, transform_indices = @transform_4, window_bounds = array<i64: 4, 8, 128>}, {pipeline_mode = #tpu.pipeline_mode<synchronous>, transform_indices = @transform_5, window_bounds = array<i64: 1, 128>}, {transform_indices = @transform_6, window_bounds = array<i64: 2, 8, 128>}]} {
    %c0 = arith.constant 0 : index
    %c0_0 = arith.constant 0 : index
    %c0_1 = arith.constant 0 : index
    %0 = vector.load %arg1[%c0, %c0_0, %c0_1] : memref<2x8x32xf32, #tpu.memory_space<vmem>>, vector<2x8x32xf32>
    %1 = vector.shape_cast %0 : vector<2x8x32xf32> to vector<2x1x8x32xf32>
    %2 = vector.shape_cast %1 : vector<2x1x8x32xf32> to vector<2x1x8x32xf32>
    %3 = vector.broadcast %2 : vector<2x1x8x32xf32> to vector<2x4x8x32xf32>
    %4 = vector.shape_cast %3 : vector<2x4x8x32xf32> to vector<8x8x32xf32>
    %c0_2 = arith.constant 0 : index
    %c0_3 = arith.constant 0 : index
    %c0_4 = arith.constant 0 : index
    %5 = vector.load %arg2[%c0_2, %c0_3, %c0_4] : memref<4x32x8xf32, #tpu.memory_space<vmem>>, vector<4x32x8xf32>
    %6 = vector.shape_cast %5 : vector<4x32x8xf32> to vector<1x4x32x8xf32>
    %7 = vector.shape_cast %6 : vector<1x4x32x8xf32> to vector<1x4x32x8xf32>
    %8 = vector.broadcast %7 : vector<1x4x32x8xf32> to vector<2x4x32x8xf32>
    %9 = vector.shape_cast %8 : vector<2x4x32x8xf32> to vector<8x32x8xf32>
    %c0_5 = arith.constant 0 : index
    %c0_6 = arith.constant 0 : index
    %c0_7 = arith.constant 0 : index
    %10 = vector.load %arg3[%c0_5, %c0_6, %c0_7] : memref<4x32x8xf32, #tpu.memory_space<vmem>>, vector<4x32x8xf32>
    %11 = vector.shape_cast %10 : vector<4x32x8xf32> to vector<1x4x32x8xf32>
    %12 = vector.shape_cast %11 : vector<1x4x32x8xf32> to vector<1x4x32x8xf32>
    %13 = vector.broadcast %12 : vector<1x4x32x8xf32> to vector<2x4x32x8xf32>
    %14 = vector.shape_cast %13 : vector<2x4x32x8xf32> to vector<8x32x8xf32>
    %c0_8 = arith.constant 0 : index
    %c0_9 = arith.constant 0 : index
    %c0_10 = arith.constant 0 : index
    %15 = vector.load %arg4[%c0_8, %c0_9, %c0_10] : memref<4x32x8xf32, #tpu.memory_space<vmem>>, vector<4x32x8xf32>
    %16 = vector.shape_cast %15 : vector<4x32x8xf32> to vector<1x4x32x8xf32>
    %17 = vector.shape_cast %16 : vector<1x4x32x8xf32> to vector<1x4x32x8xf32>
    %18 = vector.broadcast %17 : vector<1x4x32x8xf32> to vector<2x4x32x8xf32>
    %19 = vector.shape_cast %18 : vector<2x4x32x8xf32> to vector<8x32x8xf32>
    %c0_11 = arith.constant 0 : index
    %c0_12 = arith.constant 0 : index
    %c0_13 = arith.constant 0 : index
    %20 = vector.load %arg5[%c0_11, %c0_12, %c0_13] : memref<4x8x128xf32, #tpu.memory_space<vmem>>, vector<4x8x128xf32>
    %21 = vector.shape_cast %20 : vector<4x8x128xf32> to vector<1x4x8x128xf32>
    %22 = vector.shape_cast %21 : vector<1x4x8x128xf32> to vector<1x4x8x128xf32>
    %23 = vector.broadcast %22 : vector<1x4x8x128xf32> to vector<2x4x8x128xf32>
    %24 = vector.shape_cast %23 : vector<2x4x8x128xf32> to vector<8x8x128xf32>
    "tpu.trace_start"() <{level = 10 : i32, message = "gtd,gdf->gtf"}> : () -> ()
    %cst = arith.constant dense<0.000000e+00> : vector<8x8x8xf32>
    %25 = tpu.matmul %4, %9, %cst {dimension_numbers = #tpu.dot_dimension_numbers<[2], [1], [1], [2], [0, 0, 0, 1, 1, 2], [0], [0]>} : vector<8x8x32xf32>, vector<8x32x8xf32>, vector<8x8x8xf32> -> vector<8x8x8xf32>
    %cst_14 = arith.constant dense<0.000000e+00> : vector<8x8x8xf32>
    %26 = tpu.matmul %4, %14, %cst_14 {dimension_numbers = #tpu.dot_dimension_numbers<[2], [1], [1], [2], [0, 0, 0, 1, 1, 2], [0], [0]>} : vector<8x8x32xf32>, vector<8x32x8xf32>, vector<8x8x8xf32> -> vector<8x8x8xf32>
    %cst_15 = arith.constant dense<0.000000e+00> : vector<8x8x8xf32>
    %27 = tpu.matmul %4, %19, %cst_15 {dimension_numbers = #tpu.dot_dimension_numbers<[2], [1], [1], [2], [0, 0, 0, 1, 1, 2], [0], [0]>} : vector<8x8x32xf32>, vector<8x32x8xf32>, vector<8x8x8xf32> -> vector<8x8x8xf32>
    "tpu.trace_stop"() : () -> ()
    "tpu.trace_start"() <{level = 10 : i32, message = "gtf,gsf->gts"}> : () -> ()
    %cst_16 = arith.constant dense<0.000000e+00> : vector<8x8x8xf32>
    %28 = tpu.matmul %25, %26, %cst_16 {dimension_numbers = #tpu.dot_dimension_numbers<[2], [2], [1], [1], [0, 0, 0, 1, 1, 1], [0], [0]>} : vector<8x8x8xf32>, vector<8x8x8xf32>, vector<8x8x8xf32> -> vector<8x8x8xf32>
    "tpu.trace_stop"() : () -> ()
    %cst_17 = arith.constant 0.353553385 : f32
    %29 = vector.broadcast %cst_17 : f32 to vector<8x8x8xf32>
    %30 = arith.mulf %28, %29 : vector<8x8x8xf32>
    %31 = tpu.iota {dimensions = array<i32: 0>} : vector<8x8xi32>
    %32 = tpu.iota {dimensions = array<i32: 1>} : vector<8x8xi32>
    %33 = arith.cmpi sge, %31, %32 : vector<8x8xi32>
    %34 = vector.shape_cast %33 : vector<8x8xi1> to vector<1x8x8xi1>
    %cst_18 = arith.constant -1.000000e+30 : f32
    %35 = vector.shape_cast %34 : vector<1x8x8xi1> to vector<1x8x8xi1>
    %36 = vector.broadcast %35 : vector<1x8x8xi1> to vector<8x8x8xi1>
    %37 = vector.broadcast %cst_18 : f32 to vector<8x8x8xf32>
    %38 = arith.select %36, %30, %37 : vector<8x8x8xi1>, vector<8x8x8xf32>
    %cst_19 = arith.constant dense<0xFF800000> : vector<8x8xf32>
    %39 = vector.multi_reduction <maximumf>, %38, %cst_19 [2] : vector<8x8x8xf32> to vector<8x8xf32>
    %40 = vector.shape_cast %39 : vector<8x8xf32> to vector<8x8x1xf32>
    %41 = vector.broadcast %40 : vector<8x8x1xf32> to vector<8x8x8xf32>
    %42 = arith.subf %38, %41 : vector<8x8x8xf32>
    %43 = math.exp %42 : vector<8x8x8xf32>
    %cst_20 = arith.constant dense<0.000000e+00> : vector<8x8xf32>
    %44 = vector.multi_reduction <add>, %43, %cst_20 [2] : vector<8x8x8xf32> to vector<8x8xf32>
    %45 = vector.shape_cast %44 : vector<8x8xf32> to vector<8x8x1xf32>
    %46 = tpu.reciprocal %45 {approx = true} : vector<8x8x1xf32> -> vector<8x8x1xf32>
    %47 = vector.broadcast %46 : vector<8x8x1xf32> to vector<8x8x8xf32>
    %48 = arith.mulf %43, %47 : vector<8x8x8xf32>
    "tpu.trace_start"() <{level = 10 : i32, message = "gts,gsf->gtf"}> : () -> ()
    %cst_21 = arith.constant dense<0.000000e+00> : vector<8x8x8xf32>
    %49 = tpu.matmul %48, %27, %cst_21 {dimension_numbers = #tpu.dot_dimension_numbers<[2], [1], [1], [2], [0, 0, 0, 1, 1, 2], [0], [0]>} : vector<8x8x8xf32>, vector<8x8x8xf32>, vector<8x8x8xf32> -> vector<8x8x8xf32>
    "tpu.trace_stop"() : () -> ()
    "tpu.trace_start"() <{level = 10 : i32, message = "gtf,gfd->gtd"}> : () -> ()
    %cst_22 = arith.constant dense<0.000000e+00> : vector<8x8x128xf32>
    %50 = tpu.matmul %49, %24, %cst_22 {dimension_numbers = #tpu.dot_dimension_numbers<[2], [1], [1], [2], [0, 0, 0, 1, 1, 2], [0], [0]>} : vector<8x8x8xf32>, vector<8x8x128xf32>, vector<8x8x128xf32> -> vector<8x8x128xf32>
    "tpu.trace_stop"() : () -> ()
    %51 = vector.shape_cast %50 : vector<8x8x128xf32> to vector<2x4x8x128xf32>
    %cst_23 = arith.constant dense<0.000000e+00> : vector<2x8x128xf32>
    %52 = vector.multi_reduction <add>, %51, %cst_23 [1] : vector<2x4x8x128xf32> to vector<2x8x128xf32>
    %c0_24 = arith.constant 0 : index
    %c0_25 = arith.constant 0 : index
    %53 = vector.load %arg6[%c0_24, %c0_25] : memref<1x128xf32, #tpu.memory_space<vmem>>, vector<1x128xf32>
    %54 = vector.shape_cast %53 : vector<1x128xf32> to vector<1x1x128xf32>
    %55 = vector.broadcast %54 : vector<1x1x128xf32> to vector<2x8x128xf32>
    %56 = arith.addf %52, %55 : vector<2x8x128xf32>
    %c0_26 = arith.constant 0 : index
    %c0_27 = arith.constant 0 : index
    %c0_28 = arith.constant 0 : index
    %57 = vector.load %arg7[%c0_26, %c0_27, %c0_28] : memref<2x8x128xf32, #tpu.memory_space<vmem>>, vector<2x8x128xf32>
    tpu.vector_store %arg7[%c0_26, %c0_27, %c0_28], %56 {strides = array<i32>} : memref<2x8x128xf32, #tpu.memory_space<vmem>>, vector<2x8x128xf32>,
    return
  }
  func.func @transform_0(%arg0: i32) -> (i32, i32, i32) {
    %c0_i32 = arith.constant 0 : i32
    %c0_i32_0 = arith.constant 0 : i32
    %c0_i32_1 = arith.constant 0 : i32
    return %arg0, %c0_i32, %c0_i32_0 : i32, i32, i32
  }
  func.func @transform_1(%arg0: i32) -> (i32, i32, i32) {
    %c0_i32 = arith.constant 0 : i32
    %c0_i32_0 = arith.constant 0 : i32
    %c0_i32_1 = arith.constant 0 : i32
    %c0_i32_2 = arith.constant 0 : i32
    return %c0_i32, %c0_i32_0, %c0_i32_1 : i32, i32, i32
  }
  func.func @transform_2(%arg0: i32) -> (i32, i32, i32) {
    %c0_i32 = arith.constant 0 : i32
    %c0_i32_0 = arith.constant 0 : i32
    %c0_i32_1 = arith.constant 0 : i32
    %c0_i32_2 = arith.constant 0 : i32
    return %c0_i32, %c0_i32_0, %c0_i32_1 : i32, i32, i32
  }
  func.func @transform_3(%arg0: i32) -> (i32, i32, i32) {
    %c0_i32 = arith.constant 0 : i32
    %c0_i32_0 = arith.constant 0 : i32
    %c0_i32_1 = arith.constant 0 : i32
    %c0_i32_2 = arith.constant 0 : i32
    return %c0_i32, %c0_i32_0, %c0_i32_1 : i32, i32, i32
  }
  func.func @transform_4(%arg0: i32) -> (i32, i32, i32) {
    %c0_i32 = arith.constant 0 : i32
    %c0_i32_0 = arith.constant 0 : i32
    %c0_i32_1 = arith.constant 0 : i32
    %c0_i32_2 = arith.constant 0 : i32
    return %c0_i32, %c0_i32_0, %c0_i32_1 : i32, i32, i32
  }
  func.func @transform_5(%arg0: i32) -> (i32, i32) {
    %c0_i32 = arith.constant 0 : i32
    %c0_i32_0 = arith.constant 0 : i32
    %c0_i32_1 = arith.constant 0 : i32
    return %c0_i32, %c0_i32_0 : i32, i32
  }
  func.func @transform_6(%arg0: i32) -> (i32, i32, i32) {
    %c0_i32 = arith.constant 0 : i32
    %c0_i32_0 = arith.constant 0 : i32
    %c0_i32_1 = arith.constant 0 : i32
    return %arg0, %c0_i32, %c0_i32_0 : i32, i32, i32
  }
}

</mosaic_0001>

<bundles_post_ra>
// kernel: tpu_custom_call.1
= control target key start
LH: loop header
LB: loop body
LE: loop exit
PB: predicated region body
PF: predicated region fallthrough
CT: control target
= control target key end

     0   :  { %v4501_v3 = vmov 0.0|0.0   ;;  %vm4502_vm0 = vmmov 0   ;;  %v4503_v11 = vmov 0.0   ;;  %vm78_vm1 = vcmask 261120   ;;  %s5025_s0 = inlined_call_operand.vmem [shape: f32[2,8,32], index: 0, kind: input, shape index: {}]   ;;  %s5026_s1 = inlined_call_operand.vmem [shape: f32[4,32,8], index: 1, kind: input, shape index: {}]   ;;  %s5027_s2 = inlined_call_operand.vmem [shape: f32[4,32,8], index: 2, kind: input, shape index: {}]   ;;  %s5028_s3 = inlined_call_operand.vmem [shape: f32[4,32,8], index: 3, kind: input, shape index: {}]   ;;  %s5029_s4 = inlined_call_operand.vmem [shape: f32[4,8,128], index: 4, kind: input, shape index: {}]   ;;  %s5030_s5 = inlined_call_operand.vmem [shape: f32[1,128], index: 5, kind: input, shape index: {}]   ;;  %s5031_s6 = inlined_call_operand.hbm [shape: f32[2,8,128], index: 6, kind: output, shape index: {}]  }
   0x1   :  { %v26_v0 = vld [vmem:[%s5026_s1] sm:$0xff]  ;;  %v27_v1 = vld [vmem:[%s5026_s1 + $0x8] sm:$0xff]  ;;  %4295 = vmatprep.subr.bf16.mxu0 %v4501_v3  ;;  %4301 = vmatprep.subr.bf16.mxu1 %v4501_v3  ;;  %v28_v6 = vld [vmem:[%s5026_s1 + $0x10] sm:$0xff] }
   0x2   :  { %v30_v2 = vld [vmem:[%s5026_s1 + $0x20] sm:$0xff]  ;;  %v4296_v4 = vpack.c.bf16 %v27_v1, %v26_v0  ;;  %v31_v5 = vld [vmem:[%s5026_s1 + $0x28] sm:$0xff]  ;;  %v29_v7 = vld [vmem:[%s5026_s1 + $0x18] sm:$0xff]  ;;  %3919 = vmatprep.mubr.msk.f32.mxu0 %vm4502_vm0, %v4503_v11  ;;  %3930 = vmatprep.mubr.msk.f32.mxu1 %vm4502_vm0, %v4503_v11 }
   0x3   :  { %v4302_v8 = vpack.c.bf16 %v31_v5, %v30_v2  ;;  %v32_v9 = vld [vmem:[%s5026_s1 + $0x30] sm:$0xff]  ;;  %v33_v10 = vld [vmem:[%s5026_s1 + $0x38] sm:$0xff]  ;;  %v4299_v12 = vpack.c.bf16 %v29_v7, %v28_v6  ;;  %v34_v14 = vld [vmem:[%s5026_s1 + $0x40] sm:$0xff] }
   0x4   :  { %4297 = vmatpush3.bf16.msra.mxu0 %v4296_v4  ;;  %v4305_v13 = vpack.c.bf16 %v33_v10, %v32_v9  ;;  %v35_v15 = vld [vmem:[%s5026_s1 + $0x48] sm:$0xff]  ;;  %v38_v16 = vld [vmem:[%s5026_s1 + $0x60] sm:$0xff]  ;;  %v36_v21 = vld [vmem:[%s5026_s1 + $0x50] sm:$0xff] }
   0x5   :  { %4303 = vmatpush3.bf16.msra.mxu1 %v4302_v8  ;;  %4298 = vmatprep.subr.bf16.mxu0 %v4501_v3  ;;  %v39_v17 = vld [vmem:[%s5026_s1 + $0x68] sm:$0xff]  ;;  %v4589_v18 = vld [vmem:[%s5025_s0] sm:$0xff]  ;;  %v4308_v19 = vpack.c.bf16 %v35_v15, %v34_v14  ;;  %v37_v22 = vld [vmem:[%s5026_s1 + $0x58] sm:$0xff] }
   0x6   :  { %4304 = vmatprep.subr.bf16.mxu1 %v4501_v3  ;;  %v4314_v20 = vpack.c.bf16 %v39_v17, %v38_v16  ;;  %v40_v23 = vld [vmem:[%s5026_s1 + $0x70] sm:$0xff]  ;;  %v41_v24 = vld [vmem:[%s5026_s1 + $0x78] sm:$0xff]  ;;  %v4311_v25 = vpack.c.bf16 %v37_v22, %v36_v21 }
   0x7   :  { %v4317_v26 = vpack.c.bf16 %v41_v24, %v40_v23 }
   0x8   :  { %4300 = vmatpush3.bf16.msra.mxu0 %v4299_v12 }
   0x9   :  { %4306 = vmatpush3.bf16.msra.mxu1 %v4305_v13  ;;  %4307 = vmatprep.subr.bf16.mxu0 %v4501_v3 }
   0xa   :  { %4313 = vmatprep.subr.bf16.mxu1 %v4501_v3 }
   0xb   :  { %3920 = vmatmul.mubr.msk.f32.vlgmr.msra.gmra.mrb[0].mxu0 %vm78_vm1, %v4589_v18 }
   0xc   :  { %3931 = vmatmul.mubr.msk.f32.vlgmr.msra.gmra.mrb[0].mxu1 %vm78_vm1, %v4589_v18  ;;  %4309 = vmatpush3.bf16.msra.mxu0 %v4308_v19 }
   0xd   :  { %4315 = vmatpush3.bf16.msra.mxu1 %v4314_v20  ;;  %4310 = vmatprep.subr.bf16.mxu0 %v4501_v3 }
   0xe   :  { %11 = vsyncpa [#allocation3], 0  ;;  %4316 = vmatprep.subr.bf16.mxu1 %v4501_v3  ;;  %3941 = vmatprep.mubr.msk.f32.mxu0 %vm4502_vm0, %v4503_v11  ;;  %v4630_v27 = vld [vmem:[%s5025_s0 + $0x8] sm:$0xff]  ;;  %v42_v28 = vld [vmem:[%s5027_s2] sm:$0xff]  ;;  %vm1765_vm2 = vcmask 64512   ;;  %s4504_s25 = smov [#allocation2]  }
   0xf   :  { %3952 = vmatprep.mubr.msk.f32.mxu1 %vm4502_vm0, %v4503_v11  ;;  %v43_v29 = vld [vmem:[%s5027_s2 + $0x8] sm:$0xff]  ;;  %v46_v30 = vld [vmem:[%s5027_s2 + $0x20] sm:$0xff]  ;;  %v44_v34 = vld [vmem:[%s5027_s2 + $0x10] sm:$0xff]  ;;  %s3675_s26 = sshll.u32 %s4504_s25, 4  ;;  %s3676_s26 = int_to_ptr.vmem [resolvable:$true] %s3675_s26 }
  0x10   :  { %4312 = vmatpush3.bf16.msra.mxu0 %v4311_v25  ;;  %v47_v31 = vld [vmem:[%s5027_s2 + $0x28] sm:$0xff]  ;;  %v4344_v32 = vpack.c.bf16 %v43_v29, %v42_v28  ;;  %v45_v35 = vld [vmem:[%s5027_s2 + $0x18] sm:$0xff]  ;;  %v48_v36 = vld [vmem:[%s5027_s2 + $0x30] sm:$0xff]  ;;  %p4482_p1 = scmp.lt.s32.totalorder %s3676_s26, %s3676_s26 }
  0x11   :  { %4318 = vmatpush3.bf16.msra.mxu1 %v4317_v26  ;;  %4319 = vmatprep.subr.bf16.mxu0 %v4501_v3  ;;  %v4350_v33 = vpack.c.bf16 %v47_v31, %v46_v30  ;;  %v49_v37 = vld [vmem:[%s5027_s2 + $0x38] sm:$0xff]  ;;  %v4347_v38 = vpack.c.bf16 %v45_v35, %v44_v34  ;;  %v50_v40 = vld [vmem:[%s5027_s2 + $0x40] sm:$0xff]  ;;  %v51_v41 = vld [vmem:[%s5027_s2 + $0x48] sm:$0xff] }
  0x12   :  { %4325 = vmatprep.subr.bf16.mxu1 %v4501_v3  ;;  %v4353_v39 = vpack.c.bf16 %v49_v37, %v48_v36  ;;  %v54_v42 = vld [vmem:[%s5027_s2 + $0x60] sm:$0xff]  ;;  %v55_v43 = vld [vmem:[%s5027_s2 + $0x68] sm:$0xff]  ;;  %v4356_v44 = vpack.c.bf16 %v51_v41, %v50_v40  ;;  %v52_v46 = vld [vmem:[%s5027_s2 + $0x50] sm:$0xff] }
  0x13   :  { %3942 = vmatmul.mubr.msk.f32.vlgmr.msra.gmra.mrb[2].mxu0 %vm78_vm1, %v4589_v18  ;;  %v4362_v45 = vpack.c.bf16 %v55_v43, %v54_v42  ;;  %v53_v47 = vld [vmem:[%s5027_s2 + $0x58] sm:$0xff]  ;;  %v56_v48 = vld [vmem:[%s5027_s2 + $0x70] sm:$0xff]  ;;  %v58_v52 = vld [vmem:[%s5028_s3] sm:$0xff] }
  0x14   :  { %3953 = vmatmul.mubr.msk.f32.vlgmr.msra.gmra.mrb[2].mxu1 %vm78_vm1, %v4589_v18  ;;  %4321 = vmatpush3.bf16.msra.mxu0 %v4296_v4  ;;  %v57_v49 = vld [vmem:[%s5027_s2 + $0x78] sm:$0xff]  ;;  %v4359_v50 = vpack.c.bf16 %v53_v47, %v52_v46  ;;  %v59_v53 = vld [vmem:[%s5028_s3 + $0x8] sm:$0xff]  ;;  %v62_v54 = vld [vmem:[%s5028_s3 + $0x20] sm:$0xff] }
  0x15   :  { %4327 = vmatpush3.bf16.msra.mxu1 %v4302_v8  ;;  %4322 = vmatprep.subr.bf16.mxu0 %v4501_v3  ;;  %v4365_v51 = vpack.c.bf16 %v57_v49, %v56_v48  ;;  %v63_v55 = vld [vmem:[%s5028_s3 + $0x28] sm:$0xff]  ;;  %v4392_v56 = vpack.c.bf16 %v59_v53, %v58_v52  ;;  %v60_v58 = vld [vmem:[%s5028_s3 + $0x10] sm:$0xff]  ;;  %v61_v59 = vld [vmem:[%s5028_s3 + $0x18] sm:$0xff] }
  0x16   :  { %4328 = vmatprep.subr.bf16.mxu1 %v4501_v3  ;;  %3963 = vmatprep.mubr.msk.f32.mxu0 %vm4502_vm0, %v4503_v11  ;;  %v4398_v57 = vpack.c.bf16 %v63_v55, %v62_v54  ;;  %v64_v60 = vld [vmem:[%s5028_s3 + $0x30] sm:$0xff]  ;;  %v4395_v61 = vpack.c.bf16 %v61_v59, %v60_v58  ;;  %v65_v62 = vld [vmem:[%s5028_s3 + $0x38] sm:$0xff]  ;;  %v66_v0 = vld [vmem:[%s5028_s3 + $0x40] sm:$0xff] }
  0x17   :  { %3974 = vmatprep.mubr.msk.f32.mxu1 %vm4502_vm0, %v4503_v11  ;;  %v4401_v63 = vpack.c.bf16 %v65_v62, %v64_v60  ;;  %v67_v1 = vld [vmem:[%s5028_s3 + $0x48] sm:$0xff]  ;;  %v70_v2 = vld [vmem:[%s5028_s3 + $0x60] sm:$0xff]  ;;  %v68_v7 = vld [vmem:[%s5028_s3 + $0x50] sm:$0xff] }
  0x18   :  { %4324 = vmatpush3.bf16.msra.mxu0 %v4299_v12  ;;  %v4404_v4 = vpack.c.bf16 %v67_v1, %v66_v0  ;;  %v71_v5 = vld [vmem:[%s5028_s3 + $0x68] sm:$0xff]  ;;  %v69_v8 = vld [vmem:[%s5028_s3 + $0x58] sm:$0xff]  ;;  %v72_v9 = vld [vmem:[%s5028_s3 + $0x70] sm:$0xff] }
  0x19   :  { %4330 = vmatpush3.bf16.msra.mxu1 %v4305_v13  ;;  %4331 = vmatprep.subr.bf16.mxu0 %v4501_v3  ;;  %v4410_v6 = vpack.c.bf16 %v71_v5, %v70_v2  ;;  %v4407_v10 = vpack.c.bf16 %v69_v8, %v68_v7  ;;  %v73_v12 = vld [vmem:[%s5028_s3 + $0x78] sm:$0xff] }
  0x1a   :  { %4337 = vmatprep.subr.bf16.mxu1 %v4501_v3  ;;  %v4413_v13 = vpack.c.bf16 %v73_v12, %v72_v9 }
  0x1b   :  { %3964 = vmatmul.mubr.msk.f32.vlgmr.msra.gmra.mrb[4].mxu0 %vm78_vm1, %v4630_v27 }
  0x1c   :  { %3975 = vmatmul.mubr.msk.f32.vlgmr.msra.gmra.mrb[4].mxu1 %vm78_vm1, %v4630_v27  ;;  %4333 = vmatpush3.bf16.msra.mxu0 %v4308_v19 }
  0x1d   :  { %4339 = vmatpush3.bf16.msra.mxu1 %v4314_v20  ;;  %4334 = vmatprep.subr.bf16.mxu0 %v4501_v3 }
  0x1e   :  { %4340 = vmatprep.subr.bf16.mxu1 %v4501_v3  ;;  %3985 = vmatprep.mubr.msk.f32.mxu0 %vm4502_vm0, %v4503_v11 }
  0x1f   :  { %3996 = vmatprep.mubr.msk.f32.mxu1 %vm4502_vm0, %v4503_v11 }
  0x20   :  { %4336 = vmatpush3.bf16.msra.mxu0 %v4311_v25 }
  0x21   :  { %4342 = vmatpush3.bf16.msra.mxu1 %v4317_v26  ;;  %4343 = vmatprep.subr.bf16.mxu0 %v4501_v3 }
  0x22   :  { %4349 = vmatprep.subr.bf16.mxu1 %v4501_v3 }
  0x23   :  { %3986 = vmatmul.mubr.msk.f32.vlgmr.msra.gmra.mrb[6].mxu0 %vm78_vm1, %v4630_v27 }
  0x24   :  { %3997 = vmatmul.mubr.msk.f32.vlgmr.msra.gmra.mrb[6].mxu1 %vm78_vm1, %v4630_v27  ;;  %4345 = vmatpush3.bf16.msra.mxu0 %v4344_v32 }
  0x25   :  { %4351 = vmatpush3.bf16.msra.mxu1 %v4350_v33  ;;  %4346 = vmatprep.subr.bf16.mxu0 %v4501_v3 }
  0x26   :  { %4352 = vmatprep.subr.bf16.mxu1 %v4501_v3  ;;  %4007 = vmatprep.mubr.msk.f32.mxu0 %vm4502_vm0, %v4503_v11 }
  0x27   :  { %4018 = vmatprep.mubr.msk.f32.mxu1 %vm4502_vm0, %v4503_v11 }
  0x28   :  { %4348 = vmatpush3.bf16.msra.mxu0 %v4347_v38 }
  0x29   :  { %4354 = vmatpush3.bf16.msra.mxu1 %v4353_v39  ;;  %4355 = vmatprep.subr.bf16.mxu0 %v4501_v3 }
  0x2a   :  { %4361 = vmatprep.subr.bf16.mxu1 %v4501_v3 }
  0x2b   :  { %4008 = vmatmul.mubr.msk.f32.vlgmr.msra.gmra.mrb[8].mxu0 %vm78_vm1, %v4589_v18 }
  0x2c   :  { %4019 = vmatmul.mubr.msk.f32.vlgmr.msra.gmra.mrb[8].mxu1 %vm78_vm1, %v4589_v18  ;;  %4357 = vmatpush3.bf16.msra.mxu0 %v4356_v44 }
  0x2d   :  { %4363 = vmatpush3.bf16.msra.mxu1 %v4362_v45  ;;  %4358 = vmatprep.subr.bf16.mxu0 %v4501_v3 }
  0x2e   :  { %4364 = vmatprep.subr.bf16.mxu1 %v4501_v3  ;;  %4029 = vmatprep.mubr.msk.f32.mxu0 %vm4502_vm0, %v4503_v11 }
  0x2f   :  { %4040 = vmatprep.mubr.msk.f32.mxu1 %vm4502_vm0, %v4503_v11 }
  0x30   :  { %4360 = vmatpush3.bf16.msra.mxu0 %v4359_v50 }
  0x31   :  { %4366 = vmatpush3.bf16.msra.mxu1 %v4365_v51  ;;  %4367 = vmatprep.subr.bf16.mxu0 %v4501_v3 }
  0x32   :  { %4373 = vmatprep.subr.bf16.mxu1 %v4501_v3 }
  0x33   :  { %4030 = vmatmul.mubr.msk.f32.vlgmr.msra.gmra.mrb[10].mxu0 %vm78_vm1, %v4589_v18 }
  0x34   :  { %4041 = vmatmul.mubr.msk.f32.vlgmr.msra.gmra.mrb[10].mxu1 %vm78_vm1, %v4589_v18  ;;  %4369 = vmatpush3.bf16.msra.mxu0 %v4344_v32 }
  0x35   :  { %4375 = vmatpush3.bf16.msra.mxu1 %v4350_v33  ;;  %4370 = vmatprep.subr.bf16.mxu0 %v4501_v3 }
  0x36   :  { %4376 = vmatprep.subr.bf16.mxu1 %v4501_v3  ;;  %4051 = vmatprep.mubr.msk.f32.mxu0 %vm4502_vm0, %v4503_v11 }
  0x37   :  { %4062 = vmatprep.mubr.msk.f32.mxu1 %vm4502_vm0, %v4503_v11 }
  0x38   :  { %4372 = vmatpush3.bf16.msra.mxu0 %v4347_v38 }
  0x39   :  { %4378 = vmatpush3.bf16.msra.mxu1 %v4353_v39  ;;  %4379 = vmatprep.subr.bf16.mxu0 %v4501_v3 }
  0x3a   :  { %4385 = vmatprep.subr.bf16.mxu1 %v4501_v3 }
  0x3b   :  { %4052 = vmatmul.mubr.msk.f32.vlgmr.msra.gmra.mrb[12].mxu0 %vm78_vm1, %v4630_v27 }
  0x3c   :  { %4063 = vmatmul.mubr.msk.f32.vlgmr.msra.gmra.mrb[12].mxu1 %vm78_vm1, %v4630_v27  ;;  %4381 = vmatpush3.bf16.msra.mxu0 %v4356_v44 }
  0x3d   :  { %4387 = vmatpush3.bf16.msra.mxu1 %v4362_v45  ;;  %4382 = vmatprep.subr.bf16.mxu0 %v4501_v3 }
  0x3e   :  { %4388 = vmatprep.subr.bf16.mxu1 %v4501_v3  ;;  %4073 = vmatprep.mubr.msk.f32.mxu0 %vm4502_vm0, %v4503_v11 }
  0x3f   :  { %4084 = vmatprep.mubr.msk.f32.mxu1 %vm4502_vm0, %v4503_v11 }
  0x40   :  { %4384 = vmatpush3.bf16.msra.mxu0 %v4359_v50 }
  0x41   :  { %4390 = vmatpush3.bf16.msra.mxu1 %v4365_v51  ;;  %4391 = vmatprep.subr.bf16.mxu0 %v4501_v3 }
  0x42   :  { %4397 = vmatprep.subr.bf16.mxu1 %v4501_v3 }
  0x43   :  { %4074 = vmatmul.mubr.msk.f32.vlgmr.msra.gmra.mrb[14].mxu0 %vm78_vm1, %v4630_v27 }
  0x44   :  { %4085 = vmatmul.mubr.msk.f32.vlgmr.msra.gmra.mrb[14].mxu1 %vm78_vm1, %v4630_v27  ;;  %4393 = vmatpush3.bf16.msra.mxu0 %v4392_v56 }
  0x45   :  { %4399 = vmatpush3.bf16.msra.mxu1 %v4398_v57  ;;  %4394 = vmatprep.subr.bf16.mxu0 %v4501_v3 }
  0x46   :  { %4400 = vmatprep.subr.bf16.mxu1 %v4501_v3  ;;  %4095 = vmatprep.mubr.msk.f32.mxu0 %vm4502_vm0, %v4503_v11 }
  0x47   :  { %4106 = vmatprep.mubr.msk.f32.mxu1 %vm4502_vm0, %v4503_v11 }
  0x48   :  { %4396 = vmatpush3.bf16.msra.mxu0 %v4395_v61 }
  0x49   :  { %4402 = vmatpush3.bf16.msra.mxu1 %v4401_v63  ;;  %4403 = vmatprep.subr.bf16.mxu0 %v4501_v3 }
  0x4a   :  { %4409 = vmatprep.subr.bf16.mxu1 %v4501_v3 }
  0x4b   :  { %4096 = vmatmul.mubr.msk.f32.vlgmr.msra.gmra.mrb[16].mxu0 %vm78_vm1, %v4589_v18 }
  0x4c   :  { %4107 = vmatmul.mubr.msk.f32.vlgmr.msra.gmra.mrb[16].mxu1 %vm78_vm1, %v4589_v18  ;;  %4405 = vmatpush3.bf16.msra.mxu0 %v4404_v4 }
  0x4d   :  { %4411 = vmatpush3.bf16.msra.mxu1 %v4410_v6  ;;  %4406 = vmatprep.subr.bf16.mxu0 %v4501_v3 }
  0x4e   :  { %4412 = vmatprep.subr.bf16.mxu1 %v4501_v3  ;;  %4117 = vmatprep.mubr.msk.f32.mxu0 %vm4502_vm0, %v4503_v11 }
  0x4f   :  { %4128 = vmatprep.mubr.msk.f32.mxu1 %vm4502_vm0, %v4503_v11 }
  0x50   :  { %4408 = vmatpush3.bf16.msra.mxu0 %v4407_v10 }
  0x51   :  { %4414 = vmatpush3.bf16.msra.mxu1 %v4413_v13  ;;  %4415 = vmatprep.subr.bf16.mxu0 %v4501_v3 }
  0x52   :  { %4421 = vmatprep.subr.bf16.mxu1 %v4501_v3 }
  0x53   :  { %4118 = vmatmul.mubr.msk.f32.vlgmr.msra.gmra.mrb[18].mxu0 %vm78_vm1, %v4589_v18 }
  0x54   :  { %4129 = vmatmul.mubr.msk.f32.vlgmr.msra.gmra.mrb[18].mxu1 %vm78_vm1, %v4589_v18  ;;  %4417 = vmatpush3.bf16.msra.mxu0 %v4392_v56 }
  0x55   :  { %4423 = vmatpush3.bf16.msra.mxu1 %v4398_v57  ;;  %4418 = vmatprep.subr.bf16.mxu0 %v4501_v3 }
  0x56   :  { %4424 = vmatprep.subr.bf16.mxu1 %v4501_v3  ;;  %4139 = vmatprep.mubr.msk.f32.mxu0 %vm4502_vm0, %v4503_v11 }
  0x57   :  { %4150 = vmatprep.mubr.msk.f32.mxu1 %vm4502_vm0, %v4503_v11 }
  0x58   :  { %4420 = vmatpush3.bf16.msra.mxu0 %v4395_v61  ;;  %v2382_v61 = vlaneseq }
  0x59   :  { %4426 = vmatpush3.bf16.msra.mxu1 %v4401_v63  ;;  %4427 = vmatprep.subr.bf16.mxu0 %v4501_v3 }
  0x5a   :  { %4433 = vmatprep.subr.bf16.mxu1 %v4501_v3  ;;  %v2383_v62 = vshrl.u32 %v2382_v61, 7  ;;  %v2385_v63 = vand.u32 127, %v2382_v61 }
  0x5b   :  { %4140 = vmatmul.mubr.msk.f32.vlgmr.msra.gmra.mrb[20].mxu0 %vm78_vm1, %v4630_v27 }
  0x5c   :  { %4151 = vmatmul.mubr.msk.f32.vlgmr.msra.gmra.mrb[20].mxu1 %vm78_vm1, %v4630_v27  ;;  %4429 = vmatpush3.bf16.msra.mxu0 %v4404_v4  ;;  %vm4900_vm3 = vcmp.ge.s32.totalorder %v2383_v62, %v2385_v63 }
  0x5d   :  { %4435 = vmatpush3.bf16.msra.mxu1 %v4410_v6  ;;  %4430 = vmatprep.subr.bf16.mxu0 %v4501_v3 }
  0x5e   :  { %4436 = vmatprep.subr.bf16.mxu1 %v4501_v3  ;;  %4161 = vmatprep.mubr.msk.f32.mxu0 %vm4502_vm0, %v4503_v11 }
  0x5f   :  { %4172 = vmatprep.mubr.msk.f32.mxu1 %vm4502_vm0, %v4503_v11 }
  0x60   :  { %4432 = vmatpush3.bf16.msra.mxu0 %v4407_v10 }
  0x61   :  { %4438 = vmatpush3.bf16.msra.mxu1 %v4413_v13  ;;  %4175 = vmatprep.subr.mxu0 %v4503_v11 }
  0x62   :  { %4180 = vmatprep.subr.mxu1 %v4503_v11 }
  0x63   :  { %4162 = vmatmul.mubr.msk.f32.vlgmr.msra.gmra.mrb[22].mxu0 %vm78_vm1, %v4630_v27 }
  0x64   :  { %4173 = vmatmul.mubr.msk.f32.vlgmr.msra.gmra.mrb[22].mxu1 %vm78_vm1, %v4630_v27  ;;  %4177 = vmatprep.mubr.msk.f32.mxu0 %vm4502_vm0, %v4503_v11 }
  0x65   :  { %4182 = vmatprep.mubr.msk.f32.mxu1 %vm4502_vm0, %v4503_v11 }
  0xde   :  { %v148_v3 = vpop.f32.mrb[0].mxu0 }
  0xdf   :  { %v3921_v14 = vpop.f32.mrb[1].mxu0  ;;  %v218_v15 = vpop.f32.mrb[0].mxu1 }
  0xe0   :  { %v3932_v16 = vpop.f32.mrb[1].mxu1 }
  0xe6   :  { %v288_v17 = vpop.f32.mrb[2].mxu0 }
  0xe7   :  { %v3943_v18 = vpop.f32.mrb[3].mxu0  ;;  %v358_v19 = vpop.f32.mrb[2].mxu1 }
  0xe8   :  { %v3954_v20 = vpop.f32.mrb[3].mxu1 }
  0xee   :  { %v431_v21 = vpop.f32.mrb[4].mxu0 }
  0xef   :  { %v3965_v22 = vpop.f32.mrb[5].mxu0  ;;  %v501_v23 = vpop.f32.mrb[4].mxu1 }
  0xf0   :  { %v3976_v24 = vpop.f32.mrb[5].mxu1 }
  0xf6   :  { %v571_v25 = vpop.f32.mrb[6].mxu0 }
  0xf7   :  { %v3987_v26 = vpop.f32.mrb[7].mxu0  ;;  %v641_v27 = vpop.f32.mrb[6].mxu1 }
  0xf8   :  { %v3998_v28 = vpop.f32.mrb[7].mxu1 }
  0xfe   :  { %v711_v29 = vpop.f32.mrb[8].mxu0 }
  0xff   :  { %v781_v30 = vpop.f32.mrb[8].mxu1  ;;  %v4009_v31 = vpop.f32.mrb[9].mxu0  ;;  %4176 = vmatpush3.xpose.msk.msra.mxu0 %vm1765_vm2, %v711_v29 }
 0x100   :  { %4181 = vmatpush3.xpose.msk.msra.mxu1 %vm1765_vm2, %v781_v30  ;;  %v4020_v32 = vpop.f32.mrb[9].mxu1  ;;  %4185 = vmatprep.subr.mxu0 %v4503_v11 }
 0x101   :  { %4190 = vmatprep.subr.mxu1 %v4503_v11 }
 0x102   :  { %4178 = vmatmul.mubr.msk.f32.vlgmr.msra.gmra.mrb[24].mxu0 %vm1765_vm2, %v148_v3 }
 0x103   :  { %4183 = vmatmul.mubr.msk.f32.vlgmr.msra.gmra.mrb[24].mxu1 %vm1765_vm2, %v218_v15  ;;  %4187 = vmatprep.mubr.msk.f32.mxu0 %vm4502_vm0, %v4503_v11 }
 0x104   :  { %4192 = vmatprep.mubr.msk.f32.mxu1 %vm4502_vm0, %v4503_v11 }
 0x106   :  { %v851_v33 = vpop.f32.mrb[10].mxu0 }
 0x107   :  { %v921_v34 = vpop.f32.mrb[10].mxu1  ;;  %v4031_v35 = vpop.f32.mrb[11].mxu0  ;;  %4186 = vmatpush3.xpose.msk.msra.mxu0 %vm1765_vm2, %v851_v33 }
 0x108   :  { %4191 = vmatpush3.xpose.msk.msra.mxu1 %vm1765_vm2, %v921_v34  ;;  %v4042_v36 = vpop.f32.mrb[11].mxu1  ;;  %4195 = vmatprep.subr.mxu0 %v4503_v11 }
 0x109   :  { %4200 = vmatprep.subr.mxu1 %v4503_v11 }
 0x10a   :  { %4188 = vmatmul.mubr.msk.f32.vlgmr.msra.gmra.mrb[26].mxu0 %vm1765_vm2, %v288_v17 }
 0x10b   :  { %4193 = vmatmul.mubr.msk.f32.vlgmr.msra.gmra.mrb[26].mxu1 %vm1765_vm2, %v358_v19  ;;  %4197 = vmatprep.mubr.msk.f32.mxu0 %vm4502_vm0, %v4503_v11 }
 0x10c   :  { %4202 = vmatprep.mubr.msk.f32.mxu1 %vm4502_vm0, %v4503_v11 }
 0x10e   :  { %v991_v37 = vpop.f32.mrb[12].mxu0 }
 0x10f   :  { %v1061_v38 = vpop.f32.mrb[12].mxu1  ;;  %v4053_v39 = vpop.f32.mrb[13].mxu0  ;;  %4196 = vmatpush3.xpose.msk.msra.mxu0 %vm1765_vm2, %v991_v37 }
 0x110   :  { %4201 = vmatpush3.xpose.msk.msra.mxu1 %vm1765_vm2, %v1061_v38  ;;  %v4064_v40 = vpop.f32.mrb[13].mxu1  ;;  %4205 = vmatprep.subr.mxu0 %v4503_v11 }
 0x111   :  { %4210 = vmatprep.subr.mxu1 %v4503_v11 }
 0x112   :  { %4198 = vmatmul.mubr.msk.f32.vlgmr.msra.gmra.mrb[28].mxu0 %vm1765_vm2, %v431_v21 }
 0x113   :  { %4203 = vmatmul.mubr.msk.f32.vlgmr.msra.gmra.mrb[28].mxu1 %vm1765_vm2, %v501_v23  ;;  %4207 = vmatprep.mubr.msk.f32.mxu0 %vm4502_vm0, %v4503_v11 }
 0x114   :  { %4212 = vmatprep.mubr.msk.f32.mxu1 %vm4502_vm0, %v4503_v11 }
 0x116   :  { %v1131_v41 = vpop.f32.mrb[14].mxu0 }
 0x117   :  { %v1201_v42 = vpop.f32.mrb[14].mxu1  ;;  %v4075_v43 = vpop.f32.mrb[15].mxu0  ;;  %4206 = vmatpush3.xpose.msk.msra.mxu0 %vm1765_vm2, %v1131_v41 }
 0x118   :  { %4211 = vmatpush3.xpose.msk.msra.mxu1 %vm1765_vm2, %v1201_v42  ;;  %v4086_v44 = vpop.f32.mrb[15].mxu1  ;;  %4215 = vmatprep.subr.mxu0 %v4503_v11 }
 0x119   :  { %4220 = vmatprep.subr.mxu1 %v4503_v11 }
 0x11a   :  { %4208 = vmatmul.mubr.msk.f32.vlgmr.msra.gmra.mrb[30].mxu0 %vm1765_vm2, %v571_v25 }
 0x11b   :  { %4213 = vmatmul.mubr.msk.f32.vlgmr.msra.gmra.mrb[30].mxu1 %vm1765_vm2, %v641_v27  ;;  %4217 = vmatprep.mubr.msk.f32.mxu0 %vm4502_vm0, %v4503_v11 }
 0x11c   :  { %4222 = vmatprep.mubr.msk.f32.mxu1 %vm4502_vm0, %v4503_v11 }
 0x11e   :  { %v1271_v45 = vpop.f32.mrb[16].mxu0 }
 0x11f   :  { %v4097_v46 = vpop.f32.mrb[17].mxu0  ;;  %4216 = vmatpush3.msra.mxu0 %v1271_v45  ;;  %v1341_v47 = vpop.f32.mrb[16].mxu1 }
 0x120   :  { %v4108_v48 = vpop.f32.mrb[17].mxu1  ;;  %4221 = vmatpush3.msra.mxu1 %v1341_v47  ;;  %4225 = vmatprep.subr.mxu0 %v4503_v11 }
 0x121   :  { %4230 = vmatprep.subr.mxu1 %v4503_v11 }
 0x126   :  { %v4888_v49 = vpop.f32.mrb[18].mxu0 }
 0x127   :  { %v4119_v50 = vpop.f32.mrb[19].mxu0  ;;  %v4890_v51 = vpop.f32.mrb[18].mxu1 }
 0x128   :  { %v4130_v52 = vpop.f32.mrb[19].mxu1 }
 0x12e   :  { %v4892_v53 = vpop.f32.mrb[20].mxu0 }
 0x12f   :  { %v4141_v54 = vpop.f32.mrb[21].mxu0  ;;  %v4894_v55 = vpop.f32.mrb[20].mxu1 }
 0x130   :  { %v4152_v56 = vpop.f32.mrb[21].mxu1 }
 0x136   :  { %v4896_v57 = vpop.f32.mrb[22].mxu0 }
 0x137   :  { %v4898_v58 = vpop.f32.mrb[22].mxu1  ;;  %v4163_v59 = vpop.f32.mrb[23].mxu0 }
 0x138   :  { %v4174_v60 = vpop.f32.mrb[23].mxu1 }
 0x1d5   :  { %v1838_v0 = vpop.f32.mrb[24].mxu0 }
 0x1d6   :  { %v2374_v2 = vmul.f32 0.35355338, %v1838_v0  ;;  %v1914_v4 = vpop.f32.mrb[24].mxu1  ;;  %v4179_v5 = vpop.f32.mrb[25].mxu0 }
 0x1d7   :  { %v2375_v6 = vmul.f32 0.35355338, %v1914_v4  ;;  %v4184_v7 = vpop.f32.mrb[25].mxu1 }
 0x1d8   :  { %v2389_v8 = vsel %vm4900_vm3, %v2374_v2, -1e+30 }
 0x1d9   :  { %v2397_v9 = vsel %vm1765_vm2, %v2389_v8, -inf  ;;  %v2390_v10 = vsel %vm4900_vm3, %v2375_v6, -1e+30 }
 0x1da   :  { %2398 = vmax.xlane.f32.xlu0 %v2397_v9  ;;  %v2400_v13 = vsel %vm1765_vm2, %v2390_v10, -inf }
 0x1dd   :  { %v1990_v12 = vpop.f32.mrb[26].mxu0 }
 0x1de   :  { %v2376_v3 = vmul.f32 0.35355338, %v1990_v12  ;;  %v2066_v14 = vpop.f32.mrb[26].mxu1  ;;  %2401 = vmax.xlane.f32.xlu0 %v2400_v13  ;;  %v4189_v15 = vpop.f32.mrb[27].mxu0 }
 0x1df   :  { %v2377_v16 = vmul.f32 0.35355338, %v2066_v14  ;;  %v4194_v17 = vpop.f32.mrb[27].mxu1 }
 0x1e0   :  { %v2391_v18 = vsel %vm4900_vm3, %v2376_v3, -1e+30 }
 0x1e1   :  { %v2403_v19 = vsel %vm1765_vm2, %v2391_v18, -inf  ;;  %v2392_v20 = vsel %vm4900_vm3, %v2377_v16, -1e+30 }
 0x1e2   :  { %2404 = vmax.xlane.f32.xlu1 %v2403_v19  ;;  %v2406_v22 = vsel %vm1765_vm2, %v2392_v20, -inf }
 0x1e5   :  { %v2142_v21 = vpop.f32.mrb[28].mxu0 }
 0x1e6   :  { %v2378_v23 = vmul.f32 0.35355338, %v2142_v21  ;;  %v2218_v24 = vpop.f32.mrb[28].mxu1  ;;  %2407 = vmax.xlane.f32.xlu1 %v2406_v22  ;;  %v4199_v25 = vpop.f32.mrb[29].mxu0 }
 0x1e7   :  { %v2379_v26 = vmul.f32 0.35355338, %v2218_v24  ;;  %v4204_v27 = vpop.f32.mrb[29].mxu1 }
 0x1e8   :  { %v2393_v28 = vsel %vm4900_vm3, %v2378_v23, -1e+30 }
 0x1e9   :  { %v2394_v29 = vsel %vm4900_vm3, %v2379_v26, -1e+30  ;;  %v2409_v30 = vsel %vm1765_vm2, %v2393_v28, -inf }
 0x1ea   :  { %v2412_v31 = vsel %vm1765_vm2, %v2394_v29, -inf  ;;  %2410 = vmax.xlane.f32.xlu0 %v2409_v30 }
 0x1eb   :  { %2413 = vmax.xlane.f32.xlu1 %v2412_v31 }
 0x1ed   :  { %v2294_v32 = vpop.f32.mrb[30].mxu0 }
 0x1ee   :  { %v2380_v33 = vmul.f32 0.35355338, %v2294_v32  ;;  %v2370_v34 = vpop.f32.mrb[30].mxu1  ;;  %v4209_v35 = vpop.f32.mrb[31].mxu0 }
 0x1ef   :  { %v2381_v36 = vmul.f32 0.35355338, %v2370_v34  ;;  %v4214_v37 = vpop.f32.mrb[31].mxu1 }
 0x1f0   :  { %v2395_v38 = vsel %vm4900_vm3, %v2380_v33, -1e+30 }
 0x1f1   :  { %v2396_v39 = vsel %vm4900_vm3, %v2381_v36, -1e+30  ;;  %v2415_v40 = vsel %vm1765_vm2, %v2395_v38, -inf }
 0x1f2   :  { %v2418_v41 = vsel %vm1765_vm2, %v2396_v39, -inf  ;;  %2416 = vmax.xlane.f32.xlu0 %v2415_v40 }
 0x1f3   :  { %2419 = vmax.xlane.f32.xlu1 %v2418_v41 }
 0x267   :  { %v2399_v42 = vpop.xlane.xlu0 %2398 }
 0x268   :  { %v2421_v43 = vsub.f32 %v2389_v8, %v2399_v42 }
 0x26a   :  { %v2429_v44 = vmul.f32 1.442695, %v2421_v43 }
 0x26b   :  { %v2402_v45 = vpop.xlane.xlu0 %2401 }
 0x26c   :  { %4445 = vpow2.f32 %v2429_v44  ;;  %v2422_v46 = vsub.f32 %v2390_v10, %v2402_v45  ;;  %v76_v45 = vld [vmem:[%s5029_s4 + $0x10] sm:$0xff] }
 0x26e   :  { %v2431_v47 = vmul.f32 1.442695, %v2422_v46 }
 0x26f   :  { %v2405_v48 = vpop.xlane.xlu1 %2404 }
 0x270   :  { %4447 = vpow2.f32 %v2431_v47  ;;  %v2423_v50 = vsub.f32 %v2391_v18, %v2405_v48  ;;  %v77_v48 = vld [vmem:[%s5029_s4 + $0x18] sm:$0xff] }
 0x272   :  { %v2433_v52 = vmul.f32 1.442695, %v2423_v50 }
 0x273   :  { %v2408_v54 = vpop.xlane.xlu1 %2407 }
 0x274   :  { %4449 = vpow2.f32 %v2433_v52  ;;  %v2424_v56 = vsub.f32 %v2392_v20, %v2408_v54 }
 0x276   :  { %v4446_v59 = vpop.eup %4445  ;;  %v2435_v60 = vmul.f32 1.442695, %v2424_v56 }
 0x277   :  { %v2411_v61 = vpop.xlane.xlu0 %2410  ;;  %v2445_v62 = vsel %vm1765_vm2, %v4446_v59, 0.0 }
 0x278   :  { %4451 = vpow2.f32 %v2435_v60  ;;  %v2414_v63 = vpop.xlane.xlu1 %2413  ;;  %v2425_v0 = vsub.f32 %v2393_v28, %v2411_v61  ;;  %2446 = vadd.xlane.f32.xlu0 %v2445_v62 }
 0x279   :  { %v2426_v1 = vsub.f32 %v2394_v29, %v2414_v63 }
 0x27a   :  { %v4448_v2 = vpop.eup %4447  ;;  %v2437_v4 = vmul.f32 1.442695, %v2425_v0 }
 0x27b   :  { %v2439_v5 = vmul.f32 1.442695, %v2426_v1  ;;  %v2448_v6 = vsel %vm1765_vm2, %v4448_v2, 0.0 }
 0x27c   :  { %4453 = vpow2.f32 %v2437_v4  ;;  %2449 = vadd.xlane.f32.xlu1 %v2448_v6 }
 0x27d   :  { %4455 = vpow2.f32 %v2439_v5 }
 0x27e   :  { %v4450_v7 = vpop.eup %4449 }
 0x27f   :  { %v2417_v8 = vpop.xlane.xlu0 %2416  ;;  %v2451_v9 = vsel %vm1765_vm2, %v4450_v7, 0.0 }
 0x280   :  { %v2420_v10 = vpop.xlane.xlu1 %2419  ;;  %v2427_v12 = vsub.f32 %v2395_v38, %v2417_v8  ;;  %2452 = vadd.xlane.f32.xlu0 %v2451_v9 }
 0x281   :  { %v2428_v13 = vsub.f32 %v2396_v39, %v2420_v10 }
 0x282   :  { %v4452_v3 = vpop.eup %4451  ;;  %v2441_v14 = vmul.f32 1.442695, %v2427_v12 }
 0x283   :  { %v2443_v15 = vmul.f32 1.442695, %v2428_v13  ;;  %v2454_v16 = vsel %vm1765_vm2, %v4452_v3, 0.0 }
 0x284   :  { %4457 = vpow2.f32 %v2441_v14  ;;  %2455 = vadd.xlane.f32.xlu1 %v2454_v16 }
 0x285   :  { %4459 = vpow2.f32 %v2443_v15 }
 0x286   :  { %v4454_v17 = vpop.eup %4453 }
 0x287   :  { %v4456_v18 = vpop.eup %4455  ;;  %v2457_v19 = vsel %vm1765_vm2, %v4454_v17, 0.0 }
 0x288   :  { %v2460_v20 = vsel %vm1765_vm2, %v4456_v18, 0.0  ;;  %2458 = vadd.xlane.f32.xlu0 %v2457_v19 }
 0x289   :  { %2461 = vadd.xlane.f32.xlu1 %v2460_v20 }
 0x28e   :  { %v4458_v21 = vpop.eup %4457 }
 0x28f   :  { %v4460_v22 = vpop.eup %4459  ;;  %v2463_v23 = vsel %vm1765_vm2, %v4458_v21, 0.0 }
 0x290   :  { %v2466_v24 = vsel %vm1765_vm2, %v4460_v22, 0.0  ;;  %2464 = vadd.xlane.f32.xlu0 %v2463_v23 }
 0x291   :  { %2467 = vadd.xlane.f32.xlu1 %v2466_v24 }
 0x305   :  { %v2447_v25 = vpop.xlane.xlu0 %2446 }
 0x306   :  { %4461 = vrcp.f32 %v2447_v25 }
 0x309   :  { %v2450_v26 = vpop.xlane.xlu1 %2449 }
 0x30a   :  { %4463 = vrcp.f32 %v2450_v26 }
 0x30d   :  { %v2453_v27 = vpop.xlane.xlu0 %2452 }
 0x30e   :  { %4465 = vrcp.f32 %v2453_v27 }
 0x310   :  { %v4462_v28 = vpop.eup %4461 }
 0x311   :  { %v2477_v29 = vmul.f32 %v4462_v28, %v4446_v59  ;;  %v2456_v30 = vpop.xlane.xlu1 %2455 }
 0x312   :  { %4467 = vrcp.f32 %v2456_v30 }
 0x313   :  { %4218 = vmatmul.mubr.msk.f32.vlgmr.msra.gmra.mrb[32].mxu0 %vm1765_vm2, %v2477_v29 }
 0x314   :  { %v4464_v31 = vpop.eup %4463  ;;  %4226 = vmatpush3.msra.mxu0 %v4888_v49  ;;  %4227 = vmatprep.mubr.msk.f32.mxu0 %vm4502_vm0, %v4503_v11 }
 0x315   :  { %v2478_v32 = vmul.f32 %v4464_v31, %v4448_v2  ;;  %v2459_v33 = vpop.xlane.xlu0 %2458  ;;  %4235 = vmatprep.subr.mxu0 %v4503_v11 }
 0x316   :  { %v2462_v34 = vpop.xlane.xlu1 %2461  ;;  %4469 = vrcp.f32 %v2459_v33 }
 0x317   :  { %4471 = vrcp.f32 %v2462_v34  ;;  %4223 = vmatmul.mubr.msk.f32.vlgmr.msra.gmra.mrb[32].mxu1 %vm1765_vm2, %v2478_v32 }
 0x318   :  { %v4466_v35 = vpop.eup %4465  ;;  %4231 = vmatpush3.msra.mxu1 %v4890_v51  ;;  %4232 = vmatprep.mubr.msk.f32.mxu1 %vm4502_vm0, %v4503_v11 }
 0x319   :  { %v2479_v36 = vmul.f32 %v4466_v35, %v4450_v7  ;;  %4240 = vmatprep.subr.mxu1 %v4503_v11 }
 0x31b   :  { %4228 = vmatmul.mubr.msk.f32.vlgmr.msra.gmra.mrb[34].mxu0 %vm1765_vm2, %v2479_v36 }
 0x31c   :  { %v4468_v49 = vpop.eup %4467  ;;  %4236 = vmatpush3.msra.mxu0 %v4892_v53  ;;  %4237 = vmatprep.mubr.msk.f32.mxu0 %vm4502_vm0, %v4503_v11 }
 0x31d   :  { %v2480_v37 = vmul.f32 %v4468_v49, %v4452_v3  ;;  %v2465_v38 = vpop.xlane.xlu0 %2464  ;;  %4245 = vmatprep.subr.mxu0 %v4503_v11 }
 0x31e   :  { %v2468_v39 = vpop.xlane.xlu1 %2467  ;;  %4473 = vrcp.f32 %v2465_v38 }
 0x31f   :  { %4475 = vrcp.f32 %v2468_v39  ;;  %4233 = vmatmul.mubr.msk.f32.vlgmr.msra.gmra.mrb[34].mxu1 %vm1765_vm2, %v2480_v37 }
 0x320   :  { %v4470_v51 = vpop.eup %4469  ;;  %4241 = vmatpush3.msra.mxu1 %v4894_v55  ;;  %4242 = vmatprep.mubr.msk.f32.mxu1 %vm4502_vm0, %v4503_v11 }
 0x321   :  { %v4472_v40 = vpop.eup %4471  ;;  %v2481_v53 = vmul.f32 %v4470_v51, %v4454_v17  ;;  %4250 = vmatprep.subr.mxu1 %v4503_v11 }
 0x322   :  { %v2482_v41 = vmul.f32 %v4472_v40, %v4456_v18 }
 0x323   :  { %4238 = vmatmul.mubr.msk.f32.vlgmr.msra.gmra.mrb[36].mxu0 %vm1765_vm2, %v2481_v53 }
 0x324   :  { %4243 = vmatmul.mubr.msk.f32.vlgmr.msra.gmra.mrb[36].mxu1 %vm1765_vm2, %v2482_v41  ;;  %4246 = vmatpush3.msra.mxu0 %v4896_v57  ;;  %v74_v57 = vld [vmem:[%s5029_s4] sm:$0xff] }
 0x325   :  { %4251 = vmatpush3.msra.mxu1 %v4898_v58  ;;  %4247 = vmatprep.mubr.msk.f32.mxu0 %vm4502_vm0, %v4503_v11  ;;  %v75_v58 = vld [vmem:[%s5029_s4 + $0x8] sm:$0xff] }
 0x326   :  { %4252 = vmatprep.mubr.msk.f32.mxu1 %vm4502_vm0, %v4503_v11  ;;  %4255 = vmatprep.subr.mxu0 %v4503_v11 }
 0x327   :  { %4260 = vmatprep.subr.mxu1 %v4503_v11 }
 0x328   :  { %v4474_v55 = vpop.eup %4473 }
 0x329   :  { %v4476_v42 = vpop.eup %4475  ;;  %v2483_v43 = vmul.f32 %v4474_v55, %v4458_v21 }
 0x32a   :  { %v2484_v44 = vmul.f32 %v4476_v42, %v4460_v22 }
 0x32b   :  { %4248 = vmatmul.mubr.msk.f32.vlgmr.msra.gmra.mrb[38].mxu0 %vm1765_vm2, %v2483_v43 }
 0x32c   :  { %4253 = vmatmul.mubr.msk.f32.vlgmr.msra.gmra.mrb[38].mxu1 %vm1765_vm2, %v2484_v44  ;;  %4257 = vmatprep.mubr.msk.f32.mxu0 %vm4502_vm0, %v4503_v11 }
 0x32d   :  { %4262 = vmatprep.mubr.msk.f32.mxu1 %vm4502_vm0, %v4503_v11  ;;  %4256 = vmatpush3.msra.mxu0 %v74_v57 }
 0x32e   :  { %4265 = vmatprep.subr.mxu0 %v4503_v11  ;;  %4261 = vmatpush3.msra.mxu1 %v75_v58 }
 0x32f   :  { %4270 = vmatprep.subr.mxu1 %v4503_v11 }
 0x3e6   :  { %v2554_v46 = vpop.f32.mrb[32].mxu0 }
 0x3e7   :  { %v4219_v47 = vpop.f32.mrb[33].mxu0  ;;  %4258 = vmatmul.mubr.msk.f32.vlgmr.msra.gmra.mrb[40].mxu0 %vm1765_vm2, %v2554_v46 }
 0x3e8   :  { %4266 = vmatpush3.msra.mxu0 %v76_v45  ;;  %4267 = vmatprep.mubr.msk.f32.mxu0 %vm4502_vm0, %v4503_v11 }
 0x3e9   :  { %4275 = vmatprep.subr.mxu0 %v4503_v11 }
 0x3ea   :  { %v2627_v50 = vpop.f32.mrb[32].mxu1 }
 0x3eb   :  { %v4224_v52 = vpop.f32.mrb[33].mxu1  ;;  %4263 = vmatmul.mubr.msk.f32.vlgmr.msra.gmra.mrb[40].mxu1 %vm1765_vm2, %v2627_v50 }
 0x3ec   :  { %4271 = vmatpush3.msra.mxu1 %v77_v48  ;;  %4272 = vmatprep.mubr.msk.f32.mxu1 %vm4502_vm0, %v4503_v11 }
 0x3ed   :  { %4280 = vmatprep.subr.mxu1 %v4503_v11 }
 0x3ee   :  { %v2700_v54 = vpop.f32.mrb[34].mxu0 }
 0x3ef   :  { %v4229_v56 = vpop.f32.mrb[35].mxu0  ;;  %4268 = vmatmul.mubr.msk.f32.vlgmr.msra.gmra.mrb[42].mxu0 %vm1765_vm2, %v2700_v54 }
 0x3f0   :  { %4276 = vmatpush3.msra.mxu0 %v74_v57  ;;  %4277 = vmatprep.mubr.msk.f32.mxu0 %vm4502_vm0, %v4503_v11 }
 0x3f1   :  { %4285 = vmatprep.subr.mxu0 %v4503_v11 }
 0x3f2   :  { %v2773_v59 = vpop.f32.mrb[34].mxu1 }
 0x3f3   :  { %v4234_v60 = vpop.f32.mrb[35].mxu1  ;;  %4273 = vmatmul.mubr.msk.f32.vlgmr.msra.gmra.mrb[42].mxu1 %vm1765_vm2, %v2773_v59 }
 0x3f4   :  { %4281 = vmatpush3.msra.mxu1 %v75_v58  ;;  %4282 = vmatprep.mubr.msk.f32.mxu1 %vm4502_vm0, %v4503_v11 }
 0x3f5   :  { %4290 = vmatprep.subr.mxu1 %v4503_v11 }
 0x3f6   :  { %v2846_v61 = vpop.f32.mrb[36].mxu0 }
 0x3f7   :  { %v2919_v62 = vpop.f32.mrb[36].mxu1  ;;  %v4239_v63 = vpop.f32.mrb[37].mxu0  ;;  %4278 = vmatmul.mubr.msk.f32.vlgmr.msra.gmra.mrb[44].mxu0 %vm1765_vm2, %v2846_v61 }
 0x3f8   :  { %v4244_v0 = vpop.f32.mrb[37].mxu1  ;;  %4283 = vmatmul.mubr.msk.f32.vlgmr.msra.gmra.mrb[44].mxu1 %vm1765_vm2, %v2919_v62  ;;  %4286 = vmatpush3.msra.mxu0 %v76_v45 }
 0x3f9   :  { %4287 = vmatprep.mubr.msk.f32.mxu0 %vm4502_vm0, %v4503_v11  ;;  %4291 = vmatpush3.msra.mxu1 %v77_v48 }
 0x3fa   :  { %4292 = vmatprep.mubr.msk.f32.mxu1 %vm4502_vm0, %v4503_v11  ;;  %v3742_v11 = vld [vmem:[%s5030_s5] ss:$0 sm:$0xff]  ;;  %s4477_s5 = scalar_lea.vmem %s3676_s26, 256 }
 0x3fb   :  { %p4478_p0 = scmp.ne.s32.totalorder %s3676_s26, %s4477_s5  ;;  %p4483_p2 = scmp.lt.s32.totalorder %s4477_s5, %s4477_s5 }
 0x3fd   :  { %p4484_p3 = por %p4483_p2, %p4482_p1 }
 0x3fe   :  { %v2992_v1 = vpop.f32.mrb[38].mxu0 }
 0x3ff   :  { %v3065_v2 = vpop.f32.mrb[38].mxu1  ;;  %v4249_v4 = vpop.f32.mrb[39].mxu0  ;;  %4288 = vmatmul.mubr.msk.f32.vlgmr.msra.gmra.mrb[46].mxu0 %vm1765_vm2, %v2992_v1  ;;  %p4485_p4 = pnand %p4484_p3, %p4478_p0 }
 0x400   :  { %v4254_v5 = vpop.f32.mrb[39].mxu1  ;;  %4293 = vmatmul.mubr.msk.f32.vlgmr.msra.gmra.mrb[46].mxu1 %vm1765_vm2, %v3065_v2 }
 0x4ba   :  { %v3138_v6 = vpop.f32.mrb[40].mxu0 }
 0x4bb   :  { %v4259_v7 = vpop.f32.mrb[41].mxu0 }
 0x4be   :  { %v3211_v8 = vpop.f32.mrb[40].mxu1 }
 0x4bf   :  { %v3653_v9 = vadd.f32 %v3211_v8, %v3138_v6  ;;  %v4264_v10 = vpop.f32.mrb[41].mxu1 }
 0x4c2   :  { %v3284_v12 = vpop.f32.mrb[42].mxu0 }
 0x4c3   :  { %v3654_v13 = vadd.f32 %v3653_v9, %v3284_v12  ;;  %v4269_v3 = vpop.f32.mrb[43].mxu0 }
 0x4c6   :  { %v3357_v14 = vpop.f32.mrb[42].mxu1 }
 0x4c7   :  { %v3655_v15 = vadd.f32 %v3654_v13, %v3357_v14  ;;  %v4274_v16 = vpop.f32.mrb[43].mxu1 }
 0x4c9   :  { %v3666_v17 = vadd.f32 %v3742_v11, %v3655_v15 }
 0x4ca   :  { %v3430_v18 = vpop.f32.mrb[44].mxu0 }
 0x4cb   :  { %3668 = vst [vmem:[#allocation2] sm:$0xff] %v3666_v17  ;;  %v3503_v19 = vpop.f32.mrb[44].mxu1  ;;  %v4279_v20 = vpop.f32.mrb[45].mxu0 }
 0x4cc   :  { %v3656_v21 = vadd.f32 %v3503_v19, %v3430_v18  ;;  %v4284_v22 = vpop.f32.mrb[45].mxu1 }
 0x4d2   :  { %v3576_v23 = vpop.f32.mrb[46].mxu0 }
 0x4d3   :  { %v3657_v24 = vadd.f32 %v3656_v21, %v3576_v23  ;;  %v3649_v25 = vpop.f32.mrb[46].mxu1  ;;  %v4289_v26 = vpop.f32.mrb[47].mxu0 }
 0x4d4   :  { %v4294_v27 = vpop.f32.mrb[47].mxu1 }
 0x4d5   :  { %v3658_v28 = vadd.f32 %v3657_v24, %v3649_v25 }
 0x4d7   :  { %v3667_v29 = vadd.f32 %v3742_v11, %v3658_v28 }
 0x4d9   :  { %3669 = vst [vmem:[#allocation2 + $0x8] sm:$0xff] %v3667_v29 }
 0x4da   :  { %4488 = shalt.err (!%p4485_p4)
}
 0x4db   :  { %s4489_s29 = scalar_lea.hbm %s5031_s6, 256 }
 0x4dc   :  { %p4490_p5 = scmp.ne.s32.totalorder %s5031_s6, %s4489_s29  ;;  %p4493_p6 = scmp.lt.u32.totalorder %s4489_s29, %s5031_s6 }
 0x4de   :  { %p4495_p7 = pnand %p4493_p6, %p4490_p5 }
 0x4e0   :  { %4498 = shalt.err (!%p4495_p7)
}
 0x4e1   :  { %s4505_s9 = smov 128   ;;  %s4506_s0 = smov 8  }
 0x4e2   :  { %3681 = dma.vmem_to_hbm [thread:$0]  %s3676_s26, 256, %s5031_s6, [#allocation3], %s4505_s9, %s4505_s9, %s4506_s0  }
 0x4e3   :  { %4499 = dma.done.wait [#allocation3], 256  }
 0x4e4   :  { %4500 = vsyncadd [#allocation3], 4294967040 }
 0x4e5   :  { %3685 = vsyncpa [#allocation3], 1 }

</bundles_post_ra>
